<compile_context>
chip_gen: v6e
topology: v6e:2x2x1
jax: 0.10.0
libtpu: 0.0.40
codegen_flags: <defaults>
</compile_context>

<pallas_src>
import numpy as np
import jax
import jax.numpy as jnp
from jax.experimental import pallas as pl
from jax.experimental.pallas import tpu as pltpu


# --------------------------------------------------------------------------- #
# Kernel
# --------------------------------------------------------------------------- #
def repulsion_kernel(tile_frame_ref, packed_ref, out_ref):
    """tile_frame_ref: (n_tiles,) int32 in SMEM (scalar-prefetched): frame id per tile.
    packed_ref: (7, tile_rows, 128) f32 block; fields = [xi, yi, zi, xj, yj, zj, sigma^2].
    out_ref:    (1, 1, F_pad) f32 lane-dense per-frame energy accumulator, resident
    across the tile (reduction) grid axis of its split."""
    c = pl.program_id(0)                 # pair-stream split (one per TensorCore on v7x)
    t = pl.program_id(1)                 # pair tile within the split (reduction axis)
    tiles_per_split = pl.num_programs(1)

    @pl.when(t == 0)
    def _():
        out_ref[...] = jnp.zeros_like(out_ref)

    # Full-vreg field slices: each load is (tile_rows, 128).
    dx = packed_ref[0] - packed_ref[3]
    dy = packed_ref[1] - packed_ref[4]
    dz = packed_ref[2] - packed_ref[5]
    d2 = dx * dx + dy * dy + dz * dz
    s2 = packed_ref[6]                    # padded slots carry sigma^2 == 0

    # (sigma/x)^6 == (sigma^2/d2)^3 : no sqrt; reciprocal runs on the EUP.
    rr = s2 * pl.reciprocal(d2, approx=False)
    # Guard: padded slots (s2 == 0) contribute exactly 0 even if d2 == 0.
    y = jnp.where(s2 > 0.0, rr * rr * rr, 0.0)          # (tile_rows, 128)

    # Frame-aligned tiles: every pair in this tile belongs to one frame whose id
    # was scalar-prefetched into SMEM -> full reduce + 1-vreg masked accumulate.
    tile_sum = jnp.sum(y)                                           # scalar f32
    frame_id = tile_frame_ref[c * tiles_per_split + t]              # int32 scalar
    lane = jax.lax.broadcasted_iota(jnp.int32, out_ref.shape, 2)    # (1, 1, F_pad)
    out_ref[...] += jnp.where(lane == frame_id, tile_sum, 0.0)


# --------------------------------------------------------------------------- #
# Wrapper
# --------------------------------------------------------------------------- #
def repulsion_energy(packed, tile_frame, n_frames, num_splits=2, *,
                     tile_rows=512, vmem_limit_bytes=32 * 1024 * 1024):
    """packed: (7, n_row_blocks, 128) f32; tile_frame: (n_tiles,) int32.
    Returns (n_frames,) f32 per-frame repulsion energy."""
    n_fields, n_row_blocks, lanes = packed.shape
    assert n_fields == 7 and lanes == 128 and packed.dtype == jnp.float32
    assert tile_rows % 8 == 0 and n_row_blocks % tile_rows == 0
    n_tiles = n_row_blocks // tile_rows
    assert n_tiles % num_splits == 0
    assert tile_frame.shape == (n_tiles,) and tile_frame.dtype == jnp.int32
    tiles_per_split = n_tiles // num_splits
    f_pad = max(128, ((n_frames + 127) // 128) * 128)   # lane-dense output

    out = pl.pallas_call(
        repulsion_kernel,
        out_shape=jax.ShapeDtypeStruct((num_splits, 1, f_pad), jnp.float32),
        grid_spec=pltpu.PrefetchScalarGridSpec(
            num_scalar_prefetch=1,
            grid=(num_splits, tiles_per_split),
            in_specs=[pl.BlockSpec(
                (7, tile_rows, 128),
                lambda c, t, tf: (0, c * tiles_per_split + t, 0))],
            out_specs=pl.BlockSpec((1, 1, f_pad), lambda c, t, tf: (c, 0, 0)),
        ),
        compiler_params=pltpu.CompilerParams(
            # split axis shards across TensorCores on v7x; tile axis is a reduction.
            dimension_semantics=("parallel", "arbitrary"),
            # ~1.75 MiB blocks double-buffered fit comfortably in 16-32 MiB on all
            # generations (v7x physical VMEM is 64 MiB).  Re-sweep tile_rows per chip.
            vmem_limit_bytes=vmem_limit_bytes,
        ),
    )(tile_frame, packed)
    # Sum the per-split rows (2 rows on v7x) and drop the frame padding.
    return out.sum(axis=0)[0, :n_frames]


# --------------------------------------------------------------------------- #
# Host-side glue (neighbor-list preprocessing + packing)
# --------------------------------------------------------------------------- #
def build_sigma_table(statistics):
    """Mirror Repulsion.__init__: dense (max_type+1, max_type+1) sigma buffer."""
    keys = np.array(list(statistics.keys()), dtype=np.int64)
    max_type = int(keys.max())
    sigma = np.zeros((max_type + 1, max_type + 1), dtype=np.float32)
    for key, stat in statistics.items():
        sigma[key] = stat["sigma"]
    return sigma


def build_frame_aligned_pairs(mapping_np, mapping_batch_np, atom_types_np,
                              sigma_table_np, n_frames, tile_p, num_splits):
    """Sort pairs by frame, pad each frame's pair list to a multiple of tile_p
    (pad slots: atom index 0, sigma^2 = 0), pad the tile count to a multiple of
    num_splits, and return flat padded index / sigma^2 arrays plus the per-tile
    frame-id table."""
    idx_i_chunks, idx_j_chunks, s2_chunks, tile_frames = [], [], [], []
    for f in range(n_frames):
        sel = np.nonzero(mapping_batch_np == f)[0]
        n = int(sel.size)
        n_tiles_f = int(np.ceil(n / tile_p)) if n > 0 else 0
        n_pad = n_tiles_f * tile_p
        ii = np.zeros(n_pad, dtype=np.int32)
        jj = np.zeros(n_pad, dtype=np.int32)
        s2 = np.zeros(n_pad, dtype=np.float32)
        if n > 0:
            ii[:n] = mapping_np[0, sel]
            jj[:n] = mapping_np[1, sel]
            sig = sigma_table_np[atom_types_np[mapping_np[0, sel]],
                                 atom_types_np[mapping_np[1, sel]]].astype(np.float32)
            s2[:n] = sig * sig
        idx_i_chunks.append(ii)
        idx_j_chunks.append(jj)
        s2_chunks.append(s2)
        tile_frames.extend([f] * n_tiles_f)

    # Pad total tile count to a multiple of num_splits with all-pad tiles.
    n_tiles = len(tile_frames)
    n_tiles_padded = int(np.ceil(max(n_tiles, 1) / num_splits)) * num_splits
    extra = n_tiles_padded - n_tiles
    if extra > 0:
        idx_i_chunks.append(np.zeros(extra * tile_p, dtype=np.int32))
        idx_j_chunks.append(np.zeros(extra * tile_p, dtype=np.int32))
        s2_chunks.append(np.zeros(extra * tile_p, dtype=np.float32))
        tile_frames.extend([0] * extra)

    idx_i = np.concatenate(idx_i_chunks)
    idx_j = np.concatenate(idx_j_chunks)
    s2 = np.concatenate(s2_chunks)
    tile_frame = np.asarray(tile_frames, dtype=np.int32)
    return idx_i, idx_j, s2, tile_frame


def pack_pairs(pos, idx_i, idx_j, sigma2):
    """Single gather from pos into the (7, rows, 128) field x row-block x lane slab."""
    # TODO(synk): emit this layout at neighbor-list construction time to avoid the
    #             extra HBM round trip (pack -> write -> kernel re-read).
    pi = pos[idx_i]                                               # (P_pad, 3)
    pj = pos[idx_j]                                               # (P_pad, 3)
    packed = jnp.concatenate([pi.T, pj.T, sigma2[None, :]], axis=0)  # (7, P_pad)
    return packed.reshape(7, packed.shape[1] // 128, 128)


# --------------------------------------------------------------------------- #
# Demo / correctness check
# --------------------------------------------------------------------------- #
if __name__ == "__main__":
    key = jax.random.PRNGKey(0)

    # ---- deterministic "statistics" (synthetic, no checkpoint) ----
    base = {(0, 0): 0.30, (0, 1): 0.35, (0, 2): 0.40,
            (1, 1): 0.45, (1, 2): 0.50, (2, 2): 0.55}
    statistics = {}
    for (a, b), s in base.items():
        statistics[(a, b)] = {"sigma": s}
        statistics[(b, a)] = {"sigma": s}
    sigma_table_np = build_sigma_table(statistics)

    # ---- small synthetic system: 4 frames, 16 beads each ----
    n_frames, n_atoms = 4, 16
    k_pos, k_typ = jax.random.split(key)
    pos = jax.random.uniform(k_pos, (n_frames * n_atoms, 3), dtype=jnp.float32,
                             minval=0.0, maxval=2.0)
    atom_types = jax.random.randint(k_typ, (n_frames * n_atoms,), 0, 3)

    # fully-connected neighbor list within each frame (host-side, as in mlcg)
    m0, m1, mb = [], [], []
    for f in range(n_frames):
        off = f * n_atoms
        for i in range(n_atoms):
            for j in range(i + 1, n_atoms):
                m0.append(off + i)
                m1.append(off + j)
                mb.append(f)
    mapping_np = np.stack([np.array(m0), np.array(m1)]).astype(np.int32)   # (2, n_pairs)
    mapping_batch_np = np.array(mb, dtype=np.int32)                        # (n_pairs,)

    # ---- frame-aligned packing (host-side neighbor-list preprocessing) ----
    TILE_ROWS = 8     # demo-sized (1024 pairs / tile); production default: 512 (~1.75 MiB)
    NUM_SPLITS = 2    # one pair-stream half per TensorCore on v7x; harmless on v5e/v6e
    tile_p = TILE_ROWS * 128
    atom_types_np = np.asarray(atom_types)
    idx_i, idx_j, sigma2, tile_frame = build_frame_aligned_pairs(
        mapping_np, mapping_batch_np, atom_types_np, sigma_table_np,
        n_frames, tile_p, NUM_SPLITS)

    packed = pack_pairs(pos, jnp.asarray(idx_i), jnp.asarray(idx_j),
                        jnp.asarray(sigma2))

    # ---- run Pallas kernel ----
    energy = repulsion_energy(packed, jnp.asarray(tile_frame), n_frames,
                              NUM_SPLITS, tile_rows=TILE_ROWS)
    energy = jax.block_until_ready(energy)

    # ---- pure-JAX reference for verification ----
    mapping = jnp.asarray(mapping_np)
    mapping_batch = jnp.asarray(mapping_batch_np)
    sigma_table = jnp.asarray(sigma_table_np)
    pos_i = pos[mapping[0]]
    pos_j = pos[mapping[1]]
    sigma_pair = sigma_table[atom_types[mapping[0]], atom_types[mapping[1]]]
    d_ref = jnp.linalg.norm(pos_i - pos_j, axis=-1)
    rr_ref = (sigma_pair / d_ref) ** 2
    y_ref = rr_ref ** 3
    energy_ref = jax.ops.segment_sum(y_ref, mapping_batch, num_segments=n_frames)

    np.testing.assert_allclose(np.asarray(energy), np.asarray(energy_ref),
                               rtol=1e-4, atol=1e-6)
    print("KERNEL_OK")
</pallas_src>

<mosaic_0001>
module attributes {stable_mosaic.version = 11 : i64} {
  func.func @repulsion_kernel(%arg0: i32, %arg1: i32, %arg2: memref<4xi32, #tpu.memory_space<smem>>, %arg3: memref<7x8x128xf32, #tpu.memory_space<vmem>>, %arg4: memref<1x1x128xf32, #tpu.memory_space<vmem>>) attributes {dimension_semantics = [#tpu.dimension_semantics<parallel>, #tpu.dimension_semantics<arbitrary>], iteration_bounds = array<i64: 2, 2>, scalar_prefetch = 1 : i64, scratch_operands = 0 : i64, tpu.core_type = #tpu.core_type<tc>, window_params = [{transform_indices = @transform_0, window_bounds = array<i64: 7, 8, 128>}, {transform_indices = @transform_1, window_bounds = array<i64: 1, 1, 128>}]} {
    %c0_i32 = arith.constant 0 : i32
    %0 = arith.cmpi eq, %arg1, %c0_i32 : i32
    %1 = arith.extui %0 : i1 to i32
    %c0_i32_0 = arith.constant 0 : i32
    %2 = arith.cmpi ne, %1, %c0_i32_0 : i32
    scf.if %2 {
      %cst_24 = arith.constant 0.000000e+00 : f32
      %50 = vector.broadcast %cst_24 : f32 to vector<1x1x128xf32>
      %c0_25 = arith.constant 0 : index
      %c0_26 = arith.constant 0 : index
      %c0_27 = arith.constant 0 : index
      %51 = vector.load %arg4[%c0_25, %c0_26, %c0_27] : memref<1x1x128xf32, #tpu.memory_space<vmem>>, vector<1x1x128xf32>
      tpu.vector_store %arg4[%c0_25, %c0_26, %c0_27], %50 {strides = array<i32>} : memref<1x1x128xf32, #tpu.memory_space<vmem>>, vector<1x1x128xf32>,
    } else {
    }
    %c0 = arith.constant 0 : index
    %c0_1 = arith.constant 0 : index
    %c0_2 = arith.constant 0 : index
    %3 = vector.load %arg3[%c0, %c0_1, %c0_2] : memref<7x8x128xf32, #tpu.memory_space<vmem>>, vector<1x8x128xf32>
    %4 = vector.shape_cast %3 : vector<1x8x128xf32> to vector<8x128xf32>
    %c3 = arith.constant 3 : index
    %c0_3 = arith.constant 0 : index
    %c0_4 = arith.constant 0 : index
    %5 = vector.load %arg3[%c3, %c0_3, %c0_4] : memref<7x8x128xf32, #tpu.memory_space<vmem>>, vector<1x8x128xf32>
    %6 = vector.shape_cast %5 : vector<1x8x128xf32> to vector<8x128xf32>
    %7 = arith.subf %4, %6 : vector<8x128xf32>
    %c1 = arith.constant 1 : index
    %c0_5 = arith.constant 0 : index
    %c0_6 = arith.constant 0 : index
    %8 = vector.load %arg3[%c1, %c0_5, %c0_6] : memref<7x8x128xf32, #tpu.memory_space<vmem>>, vector<1x8x128xf32>
    %9 = vector.shape_cast %8 : vector<1x8x128xf32> to vector<8x128xf32>
    %c4 = arith.constant 4 : index
    %c0_7 = arith.constant 0 : index
    %c0_8 = arith.constant 0 : index
    %10 = vector.load %arg3[%c4, %c0_7, %c0_8] : memref<7x8x128xf32, #tpu.memory_space<vmem>>, vector<1x8x128xf32>
    %11 = vector.shape_cast %10 : vector<1x8x128xf32> to vector<8x128xf32>
    %12 = arith.subf %9, %11 : vector<8x128xf32>
    %c2 = arith.constant 2 : index
    %c0_9 = arith.constant 0 : index
    %c0_10 = arith.constant 0 : index
    %13 = vector.load %arg3[%c2, %c0_9, %c0_10] : memref<7x8x128xf32, #tpu.memory_space<vmem>>, vector<1x8x128xf32>
    %14 = vector.shape_cast %13 : vector<1x8x128xf32> to vector<8x128xf32>
    %c5 = arith.constant 5 : index
    %c0_11 = arith.constant 0 : index
    %c0_12 = arith.constant 0 : index
    %15 = vector.load %arg3[%c5, %c0_11, %c0_12] : memref<7x8x128xf32, #tpu.memory_space<vmem>>, vector<1x8x128xf32>
    %16 = vector.shape_cast %15 : vector<1x8x128xf32> to vector<8x128xf32>
    %17 = arith.subf %14, %16 : vector<8x128xf32>
    %18 = arith.mulf %7, %7 : vector<8x128xf32>
    %19 = arith.mulf %12, %12 : vector<8x128xf32>
    %20 = arith.addf %18, %19 : vector<8x128xf32>
    %21 = arith.mulf %17, %17 : vector<8x128xf32>
    %22 = arith.addf %20, %21 : vector<8x128xf32>
    %c6 = arith.constant 6 : index
    %c0_13 = arith.constant 0 : index
    %c0_14 = arith.constant 0 : index
    %23 = vector.load %arg3[%c6, %c0_13, %c0_14] : memref<7x8x128xf32, #tpu.memory_space<vmem>>, vector<1x8x128xf32>
    %24 = vector.shape_cast %23 : vector<1x8x128xf32> to vector<8x128xf32>
    %25 = tpu.reciprocal %22 : vector<8x128xf32> -> vector<8x128xf32>
    %26 = arith.mulf %24, %25 : vector<8x128xf32>
    %cst = arith.constant 0.000000e+00 : f32
    %27 = vector.broadcast %cst : f32 to vector<8x128xf32>
    %28 = arith.cmpf ogt, %24, %27 : vector<8x128xf32>
    %29 = arith.mulf %26, %26 : vector<8x128xf32>
    %30 = arith.mulf %29, %26 : vector<8x128xf32>
    %cst_15 = arith.constant 0.000000e+00 : f32
    %31 = vector.broadcast %cst_15 : f32 to vector<8x128xf32>
    %32 = arith.select %28, %30, %31 : vector<8x128xi1>, vector<8x128xf32>
    %33 = vector.shape_cast %32 : vector<8x128xf32> to vector<1x8x128xf32>
    %cst_16 = arith.constant dense<0.000000e+00> : vector<1xf32>
    %34 = vector.multi_reduction <add>, %33, %cst_16 [1, 2] : vector<1x8x128xf32> to vector<1xf32>
    %35 = vector.shape_cast %34 : vector<1xf32> to vector<1x1x1xf32>
    %36 = vector.extract %35[0, 0, 0] : f32 from vector<1x1x1xf32>
    %c2_i32 = arith.constant 2 : i32
    %37 = arith.muli %arg0, %c2_i32 : i32
    %38 = arith.addi %37, %arg1 : i32
    %39 = arith.index_cast %38 : i32 to index
    %40 = memref.load %arg2[%39] : memref<4xi32, #tpu.memory_space<smem>>
    %41 = tpu.iota {dimensions = array<i32: 2>} : vector<1x1x128xi32>
    %c0_17 = arith.constant 0 : index
    %c0_18 = arith.constant 0 : index
    %c0_19 = arith.constant 0 : index
    %42 = vector.load %arg4[%c0_17, %c0_18, %c0_19] : memref<1x1x128xf32, #tpu.memory_space<vmem>>, vector<1x1x128xf32>
    %43 = vector.broadcast %40 : i32 to vector<1x1x128xi32>
    %44 = arith.cmpi eq, %41, %43 : vector<1x1x128xi32>
    %cst_20 = arith.constant 0.000000e+00 : f32
    %45 = vector.broadcast %36 : f32 to vector<1x1x128xf32>
    %46 = vector.broadcast %cst_20 : f32 to vector<1x1x128xf32>
    %47 = arith.select %44, %45, %46 : vector<1x1x128xi1>, vector<1x1x128xf32>
    %48 = arith.addf %42, %47 : vector<1x1x128xf32>
    %c0_21 = arith.constant 0 : index
    %c0_22 = arith.constant 0 : index
    %c0_23 = arith.constant 0 : index
    %49 = vector.load %arg4[%c0_21, %c0_22, %c0_23] : memref<1x1x128xf32, #tpu.memory_space<vmem>>, vector<1x1x128xf32>
    tpu.vector_store %arg4[%c0_21, %c0_22, %c0_23], %48 {strides = array<i32>} : memref<1x1x128xf32, #tpu.memory_space<vmem>>, vector<1x1x128xf32>,
    return
  }
  func.func @transform_0(%arg0: i32, %arg1: i32, %arg2: memref<4xi32, #tpu.memory_space<smem>>) -> (i32, i32, i32) {
    %c2_i32 = arith.constant 2 : i32
    %0 = arith.muli %arg0, %c2_i32 : i32
    %1 = arith.addi %0, %arg1 : i32
    %c0_i32 = arith.constant 0 : i32
    %c0_i32_0 = arith.constant 0 : i32
    %c0_i32_1 = arith.constant 0 : i32
    return %c0_i32, %1, %c0_i32_0 : i32, i32, i32
  }
  func.func @transform_1(%arg0: i32, %arg1: i32, %arg2: memref<4xi32, #tpu.memory_space<smem>>) -> (i32, i32, i32) {
    %c0_i32 = arith.constant 0 : i32
    %c0_i32_0 = arith.constant 0 : i32
    %c0_i32_1 = arith.constant 0 : i32
    return %arg0, %c0_i32, %c0_i32_0 : i32, i32, i32
  }
}

</mosaic_0001>

<bundles_post_ra>
// kernel: tpu_custom_call.1
= control target key start
LH: loop header
LB: loop body
LE: loop exit
PB: predicated region body
PF: predicated region fallthrough
CT: control target
= control target key end

     0   :  { %s596_s9 = smov [#allocation3]   ;;  %s818_s0 = inlined_call_operand.hbm [shape: s32[4], index: 0, kind: input, shape index: {}]   ;;  %s819_s1 = inlined_call_operand.hbm [shape: f32[7,32,128], index: 1, kind: input, shape index: {}]   ;;  %s820_s2 = inlined_call_operand.hbm [shape: f32[2,1,128], index: 2, kind: output, shape index: {}]  }
   0x1   :  { %8 = dma.hbm_to_smem %s818_s0, 16, %s596_s9, [#allocation2] }
   0x2   :  { %542 = dma.done.wait [#allocation2], 16 }
   0x3   :  { %543 = vsyncadd [#allocation2], 4294967280 }
   0x4   :  { %10 = sfence }
   0x5   :  { %11 = vsyncpa [#allocation5], 0 }
   0x6   :  { %13 = vsyncpa [#allocation5 + $0x1], 0 }
   0x7   :  { %14 = vsyncpa [#allocation6], 0 }
   0x8   :  { %16 = vsyncpa [#allocation6 + $0x1], 0  ;;  %s621_s12 = smov 0   ;;  %s623_s13 = smov 0  }
   0x9   :  { %s625_s14 = smov 0   ;;  %s627_s15 = smov 0  }
   0xa   :  { %s629_s16 = smov 0   ;;  %s631_s17 = smov 0  }
   0xb   :  { %s633_s0 = smov 0   ;;  %s635_s18 = smov 0  }
   0xc   :  { %s637_s19 = smov 0   ;;  %s639_s20 = smov 0  }
   0xd   :  { %s641_s21 = smov 0  }
   0xe LB: > { %s303_s22 = sadd.s32 4294967295, %s594_s21   ;;  %s304_s23 = sadd.s32 4294967294, %s594_s21   ;;  %s594_s21 = sphi %s641_s21, %s22_s21   ;;  %s590_s20 = sphi %s639_s20, %s838_s20   ;;  %s586_s19 = sphi %s637_s19, %s837_s19   ;;  %s582_s18 = sphi %s635_s18, %s836_s18   ;;  %s578_s0 = sphi %s633_s0, %s835_s0   ;;  %s574_s17 = sphi %s631_s17, %s834_s17   ;;  %s570_s16 = sphi %s629_s16, %s833_s16   ;;  %s566_s15 = sphi %s627_s15, %s832_s15   ;;  %s562_s14 = sphi %s625_s14, %s831_s14   ;;  %s558_s13 = sphi %s623_s13, %s830_s13   ;;  %s554_s12 = sphi %s621_s12, %s829_s12  }
   0xf   : > { %s31_s24 = sadd.s32 1, %s586_s19  ;;  %s34_s25 = sadd.s32 1, %s590_s20 }
  0x10   : > { %p32_p0 = scmp.ge.s32.totalorder %s31_s24, 2  ;;  %s305_s26 = sshll.u32 %s590_s20, 1 }
  0x11   : > { %s680_s27 = sadd.s32 %s586_s19, %s305_s26  ;;  %s45_s28 = sadd.s32 1, %s574_s17 }
  0x12   : > { %s840_s24 = smov (%p32_p0, %s31_s24), 0  ;;  %s842_s25 = smov (!%p32_p0, %s34_s25), %s590_s20 }
  0x13   : > { %p52_p1 = scmp.ne.s32.totalorder %s574_s17, %s570_s16  ;;  %p53_p2 = scmp.eq.s32.totalorder %s594_s21, 0 }
  0x14   : > { %p36_p3 = scmp.ge.s32.totalorder %s842_s25, 2  ;;  %p58_p4 = scmp.ne.s32.totalorder %s570_s16, %s566_s15 }
  0x15   : > { %p690_p5 = por %p53_p2, %p52_p1  ;;  %p59_p6 = scmp.eq.s32.totalorder %s303_s22, 0 }
  0x16   : > { %s844_s25 = smov (%p36_p3, %s842_s25), 0  ;;  %s71_s3 = sadd.s32 1, %s562_s14 }
  0x17   : > { %823 = sst [smem:[#allocation11_spill]] %s844_s25  ;;  %p696_p7 = por %p59_p6, %p58_p4 }
  0x18   : > { %s306_s4 = sshll.u32 %s844_s25, 1  ;;  %s68_s5 = ssub.s32 %s590_s20, %s844_s25 }
  0x19   : > { %s41_s6 = sadd.s32 %s306_s4, %s840_s24  ;;  %p69_p8 = scmp.eq.s32.totalorder %s68_s5, 0 }
  0x1a   : > { %s42_s7 = ssub.s32 %s680_s27, %s41_s6  ;;  %p81_p9 = scmp.ne.s32.totalorder %s562_s14, %s558_s13 }
  0x1b   : > { %p43_p10 = scmp.eq.s32.totalorder %s42_s7, 0  ;;  %p82_p11 = scmp.eq.s32.totalorder %s303_s22, 3 }
  0x1c   : > { %s709_s8 = scalar_select %p69_p8, %s562_s14, %s71_s3  }
  0x1d   : > { %s712_s9 = scalar_select %p43_p10, %s574_s17, %s45_s28  }
  0x1e   : > { %p714_p12 = por %p82_p11, %p81_p9  ;;  %p87_p13 = scmp.ne.s32.totalorder %s558_s13, %s554_s12 }
  0x1f   : > { %p88_p0 = scmp.eq.s32.totalorder %s304_s23, 3  ;;  %p339_p1 = scmp.lt.s32.totalorder %s594_s21, 4 }
  0x20   : > { %s108_s11 = sand.u32 1, %s574_s17   ;;  %s310_s22 = sshll.u32 %s680_s27, 7 }
  0x21   : > { %p724_p2 = por %p88_p0, %p87_p13  ;;  %s323_s26 = smul.u32 56, %s108_s11 }
  0x22   : > { %s119_s28 = scalar_lea.hbm %s819_s1, %s310_s22  ;;  %p734_p3 = pnand %p339_p1, %p690_p5 }
  0x23   : > { %s112_s6 = scalar_lea.vmem [#allocation4], %s323_s26  ;;  %p311_p4 = scmp.ge.s32.totalorder %s594_s21, 1 }
  0x24   : > { %s120_s23 = sshll.u32 %s112_s6, 4  ;;  %s109_s7 = scalar_lea.sflag [#allocation5], %s108_s11  ;;  %s121_s23 = int_to_ptr.vmem [resolvable:$true] %s120_s23 }
  0x25   : > { %p446_p6 = pneg %p734_p3  ;;  %s457_s25 = scalar_lea.vmem %s121_s23, 896 }
  0x26   : > { %p458_p8 = scmp.ne.s32.totalorder %s121_s23, %s457_s25  ;;  %s597_s27 = smov [#allocation4]  }
  0x27   : > { %s462_s4 = sshll.u32 %s597_s27, 4  ;;  %s463_s4 = int_to_ptr.vmem [resolvable:$false] %s462_s4 }
  0x28   : > { %p460_p9 = pnand %p458_p8, %p446_p6  ;;  %s464_s29 = scalar_lea.vmem %s463_s4, 1792 }
  0x29   : > { %p465_p5 = scmp.lt.s32.totalorder %s121_s23, %s463_s4  ;;  %p466_p11 = scmp.lt.s32.totalorder %s464_s29, %s457_s25 }
  0x2a   : > { %p461_p10 = pneg %p460_p9 }
  0x2b   : > { %p467_p13 = por %p466_p11, %p465_p5 }
  0x2d   : > { %p468_p0 = pnand %p467_p13, %p461_p10 }
  0x2f   : > { %471 = shalt.err (!%p468_p0)
}
  0x30   : > { %s598_s26 = smov 512   ;;  %s599_s11 = smov 128  }
  0x31   : > { %s600_s22 = smov 8   ;;  %p128_p1 = scmp.lt.s32.totalorder %s594_s21, 5 }
  0x32   : > { %334 = dma.hbm_to_vmem [thread:$0]  (!%p734_p3), %s119_s28, 896, %s121_s23, %s109_s7, %s598_s26, %s599_s11, %s600_s22  }
  0x33   : > { %p129_p6 = pnand %p311_p4, %p128_p1 }
  0x34   : > { %s134_s3 = sand.u32 (!%p129_p6), 1, %s570_s16  }
  0x35   : > { %132 = sbr.rel (%p129_p6) target bundleno = 316 (0x13c), region = 24  ;;  %s135_s25 = scalar_lea.sflag (!%p129_p6), [#allocation5], %s134_s3 }
  0x36   : > { %s324_s6 = smul.u32 (!%p129_p6), 56, %s134_s3 }
  0x38   : > { %s138_s27 = scalar_lea.vmem (!%p129_p6), [#allocation4], %s324_s6 }
  0x3a   : > { %545 = dma.done.wait (%p696_p7), %s135_s25, 896  }
  0x3b   : > { %547 = vsyncadd (%p696_p7), %s135_s25, 4294966400  ;;  %s154_s4 = sand.u32 1, %s558_s13   ;;  %p312_p3 = scmp.ne.s32.totalorder %s578_s0, 0 }
  0x3c   : > { %s754_s28 = scalar_lea.vmem [#allocation7], %s154_s4 }
  0x3d   : > { %161 = sbr.rel (%p312_p3) target bundleno = 68 (0x44), region = 32 }
  0x42   : > { %v601_v0 = vmov 0.0  }
  0x43   : > { %162 = vst [vmem:[%s754_s28] sm:$0x1] %v601_v0 }
  0x44 PF: > { %v163_v1 = vld [vmem:[%s138_s27] sm:$0xff]  ;;  %v313_v2 = vld [vmem:[%s138_s27 + $0x18] sm:$0xff]  ;;  %v314_v3 = vld [vmem:[%s138_s27 + $0x8] sm:$0xff]  ;;  %s319_s30 = sshll.u32 %s582_s18, 1  ;;  %v202_v28 = vlaneseq  ;;  %s320_s7 = sshll.u32 %s582_s18, 4 }
  0x45   : > { %v166_v4 = vsub.f32 %v163_v1, %v313_v2  ;;  %v315_v5 = vld [vmem:[%s138_s27 + $0x20] sm:$0xff]  ;;  %v316_v6 = vld [vmem:[%s138_s27 + $0x10] sm:$0xff]  ;;  %v317_v7 = vld [vmem:[%s138_s27 + $0x28] sm:$0xff]  ;;  %s200_s5 = sadd.s32 %s578_s0, %s319_s30  ;;  %s224_s26 = sshll.u32 %s754_s28, 4  ;;  %s225_s26 = int_to_ptr.vmem [resolvable:$true] %s224_s26 }
  0x46   : > { %v171_v8 = vsub.f32 %v314_v3, %v315_v5  ;;  %v176_v9 = vsub.f32 %v316_v6, %v317_v7  ;;  %v318_v15 = vld [vmem:[%s138_s27 + $0x30] sm:$0xff]  ;;  %s201_s23 = sld [smem:[#allocation3 + %s200_s5]]  ;;  %v203_v29 = vand.u32 127, %v202_v28  ;;  %s222_s3 = scalar_lea.hbm %s820_s2, %s320_s7 }
  0x47   : > { %v177_v10 = vmul.f32 %v166_v4, %v166_v4  ;;  %vm186_vm0 = vcmp.gt.f32.partialorder %v318_v15, 0.0  ;;  %s212_s0 = scalar_lea.sflag [#allocation6], %s154_s4  ;;  %s472_s6 = scalar_lea.vmem %s225_s26, 16 }
  0x48   : > { %v178_v11 = vmul.f32 %v171_v8, %v171_v8  ;;  %v180_v12 = vmul.f32 %v176_v9, %v176_v9  ;;  %p473_p7 = scmp.ne.s32.totalorder %s225_s26, %s472_s6  ;;  %s602_s18 = smov [#allocation7]  }
  0x49   : > { %s476_s25 = sshll.u32 %s602_s18, 4  ;;  %s477_s25 = int_to_ptr.vmem [resolvable:$false] %s476_s25 }
  0x4a   : > { %v179_v13 = vadd.f32 %v178_v11, %v177_v10  ;;  %v204_v31 = vld [vmem:[%s754_s28] sm:$0x1]  ;;  %p474_p4 = pnand %p473_p7, %p714_p12  ;;  %s478_s27 = scalar_lea.vmem %s477_s25, 32 }
  0x4b   : > { %p479_p9 = scmp.lt.s32.totalorder %s225_s26, %s477_s25  ;;  %p480_p10 = scmp.lt.s32.totalorder %s478_s27, %s472_s6 }
  0x4c   : > { %v181_v14 = vadd.f32 %v180_v12, %v179_v13  ;;  %v205_v30 = vstv %s201_s23  ;;  %p475_p8 = pneg %p474_p4 }
  0x4d   : > { %vm206_vm1 = vcmp.eq.s32.totalorder %v203_v29, %v205_v30  ;;  %p481_p5 = por %p480_p10, %p479_p9 }
  0x4e   : > { %434 = vrcp.f32 %v181_v14 }
  0x4f   : > { %p482_p11 = pnand %p481_p5, %p475_p8 }
  0x5b   : > { %v435_v16 = vpop.eup %434 }
  0x5c   : > { %v185_v17 = vmul.f32 %v435_v16, %v318_v15 }
  0x5e   : > { %v187_v18 = vmul.f32 %v185_v17, %v185_v17 }
  0x60   : > { %v188_v19 = vmul.f32 %v187_v18, %v185_v17 }
  0x62   : > { %v189_v20 = vsel %vm186_vm0, %v188_v19, 0.0 }
  0x63   : > { %190 = vadd.xlane.f32.xlu0 %v189_v20 }
  0xec   : > { %v191_v21 = vpop.xlane.xlu0 %190 }
  0xed   : > { %v192_v22 = vrot.slane %v191_v21, 4 }
  0xef   : > { %v193_v23 = vadd.f32 %v192_v22, %v191_v21 }
  0xf1   : > { %v194_v24 = vrot.slane %v193_v23, 2 }
  0xf3   : > { %v195_v25 = vadd.f32 %v194_v24, %v193_v23 }
  0xf5   : > { %v196_v26 = vrot.slane %v195_v25, 1 }
  0xf7   : > { %v197_v27 = vadd.f32 %v196_v26, %v195_v25 }
  0xf9   : > { %325 = vpush %v197_v27 }
 0x12a   : > { %s326_s29 = spop %325 }
 0x12b   : > { %v207_v32 = vstv %s326_s29 }
 0x12c   : > { %v208_v33 = vsel %vm206_vm1, %v207_v32, 0.0 }
 0x12d   : > { %v209_v34 = vadd.f32 %v208_v33, %v204_v31 }
 0x12f   : > { %210 = vst [vmem:[%s754_s28] sm:$0x1] %v209_v34 }
 0x130   : > { %485 = shalt.err (!%p482_p11)
}
 0x131   : > { %s486_s30 = scalar_lea.hbm %s222_s3, 16  ;;  %s490_s5 = scalar_lea.hbm %s820_s2, 32 }
 0x132   : > { %p487_p13 = scmp.ne.s32.totalorder %s222_s3, %s486_s30  ;;  %p491_p6 = scmp.lt.s32.totalorder %s222_s3, %s820_s2 }
 0x133   : > { %p492_p3 = scmp.lt.s32.totalorder %s490_s5, %s486_s30 }
 0x134   : > { %p488_p0 = pnand %p487_p13, %p714_p12 }
 0x135   : > { %p493_p7 = por %p492_p3, %p491_p6 }
 0x136   : > { %p489_p1 = pneg %p488_p0 }
 0x138   : > { %p494_p4 = pnand %p493_p7, %p489_p1 }
 0x13a   : > { %497 = shalt.err (!%p494_p4)
}
 0x13b   : > { %329 = dma.vmem_to_hbm [thread:$0]  (%p714_p12), %s225_s26, 16, %s222_s3, %s212_s0  }
 0x13c PF: > { %p340_p8 = scmp.ge.s32.totalorder %s594_s21, 2  ;;  %s236_s29 = sand.u32 1, %s554_s12  }
 0x13d   : > { %s237_s11 = scalar_lea.sflag [#allocation6], %s236_s29 }
 0x13e   : > { %p336_p9 = pnand %p340_p8, %p724_p2 }
 0x140   : > { %p337_p10 = pneg %p336_p9 }
 0x142   : > { %549 = dma.done.wait (%p337_p10), %s237_s11, 16  }
 0x143   : > { %551 = vsyncadd (%p337_p10), %s237_s11, 4294967280  ;;  %s22_s21 = sadd.s32 1, %s594_s21   ;;  %s828_s10 = sld [smem:[#allocation11_spill]] }
 0x144   : > { %p19_p5 = scmp.ge.s32.totalorder %s22_s21, 6   ;;  %s829_s12 = smov %s558_s13 }
 0x145   : > { %s830_s13 = smov %s562_s14  ;;  %s831_s14 = smov %s709_s8 }
 0x146   : > { %s832_s15 = smov %s570_s16  ;;  %s833_s16 = smov %s574_s17 }
 0x147   : > { %s834_s17 = smov %s712_s9  ;;  %s835_s0 = smov %s586_s19 }
 0x148   : > { %s836_s18 = smov %s590_s20  ;;  %s837_s19 = smov %s840_s24 }
 0x149   : > { %s838_s20 = smov %s828_s10  ;;  %21 = sbr.rel (!%p19_p5) target bundleno = 14 (0xe), region = 79 }
 0x14e   :  { %241 = vsyncpa [#allocation5], 1 }
 0x14f   :  { %243 = vsyncpa [#allocation5 + $0x1], 1 }
 0x150   :  { %244 = vsyncpa [#allocation6], 1 }
 0x151   :  { %246 = vsyncpa [#allocation6 + $0x1], 1 }

</bundles_post_ra>
